<compile_context>
chip_gen: v7x
topology: tpu7x:2x2x1
jax: 0.10.0
libtpu: 0.0.40
codegen_flags: <defaults>
</compile_context>

<pallas_src>
import jax
import jax.numpy as jnp
from jax.experimental import pallas as pl
from jax.experimental.pallas import tpu as pltpu


def _round_up(n, m):
    return ((n + m - 1) // m) * m


def _cdiv(a, b):
    return -(-a // b)


def mlp_kernel(x_ref, w1_ref, b1_ref, w2_ref, b2_ref, w3_ref, b3_ref, o_ref):
    # fc1 + ReLU : (TB, 4) @ (4, 32) -> (TB, 32)
    h1 = jnp.dot(x_ref[...], w1_ref[...],
                 preferred_element_type=jnp.float32,
                 precision=jax.lax.Precision.HIGHEST)
    h1 = jnp.maximum(h1 + b1_ref[...], 0.0)
    # fc2 + ReLU : (TB, 32) @ (32, 16) -> (TB, 16)
    h2 = jnp.dot(h1, w2_ref[...],
                 preferred_element_type=jnp.float32,
                 precision=jax.lax.Precision.HIGHEST)
    h2 = jnp.maximum(h2 + b2_ref[...], 0.0)
    # fc3 : (TB, 16) @ (16, 3) -> (TB, 3)   (unpadded; HBM write is 12 B/row)
    out = jnp.dot(h2, w3_ref[...],
                  preferred_element_type=jnp.float32,
                  precision=jax.lax.Precision.HIGHEST)
    o_ref[...] = (out + b3_ref[...]).astype(o_ref.dtype)


def _choose_tiling(B, batch_tile):
    """Pick (batch tile, grid steps).

    Large tiles amortize the ~0.35us/step grid overhead; for medium/large
    batches keep >=2 steps so the "parallel" grid axis can feed both v7x
    TensorCores.  The tile is a multiple of 8 sublanes; Pallas handles the
    ragged tail block, so no wrapper-side batch padding is needed.
    """
    steps = max(_cdiv(B, batch_tile), 2 if B >= 512 else 1)
    tb = _round_up(_cdiv(B, steps), 8)
    return tb, _cdiv(B, tb)


def net_forward(x, params, *, batch_tile=4096):
    """Forward pass of Net for x of shape (B, 4), float32 -> (B, 3) float32."""
    B, f_in = x.shape
    assert f_in == 4, f_in
    n_out = params["w3"].shape[1]            # 3

    TB, n_steps = _choose_tiling(B, batch_tile)
    const = lambda i: (0, 0)                 # weights/biases pinned in VMEM

    flops = 2 * B * (4 * 32 + 32 * 16 + 16 * n_out)
    bytes_accessed = 4 * (B * (4 + n_out)
                          + 4 * 32 + 32 + 32 * 16 + 16 + 16 * n_out + n_out)

    return pl.pallas_call(
        mlp_kernel,
        out_shape=jax.ShapeDtypeStruct((B, n_out), jnp.float32),
        grid=(n_steps,),
        in_specs=[
            pl.BlockSpec((TB, 4), lambda i: (i, 0)),     # x: batch-tiled
            pl.BlockSpec((4, 32), const),                # w1
            pl.BlockSpec((1, 32), const),                # b1
            pl.BlockSpec((32, 16), const),               # w2
            pl.BlockSpec((1, 16), const),                # b2
            pl.BlockSpec((16, n_out), const),            # w3 (unpadded)
            pl.BlockSpec((1, n_out), const),             # b3 (unpadded)
        ],
        out_specs=pl.BlockSpec((TB, n_out), lambda i: (i, 0)),
        compiler_params=pltpu.CompilerParams(
            dimension_semantics=("parallel",),
            vmem_limit_bytes=32 * 1024 * 1024),
        cost_estimate=pl.CostEstimate(
            flops=flops, transcendentals=0, bytes_accessed=bytes_accessed),
    )(x, params["w1"], params["b1"], params["w2"], params["b2"],
      params["w3"], params["b3"])


def init_params(key):
    """Deterministic init mimicking nn.Linear's U(-1/sqrt(fan_in), 1/sqrt(fan_in))."""
    def linear(key, fan_in, fan_out):
        kw, kb = jax.random.split(key)
        bound = 1.0 / jnp.sqrt(fan_in)
        # stored as (in, out) == PyTorch weight (out, in) transposed
        w = jax.random.uniform(kw, (fan_in, fan_out), jnp.float32, -bound, bound)
        b = jax.random.uniform(kb, (1, fan_out), jnp.float32, -bound, bound)
        return w, b

    k1, k2, k3 = jax.random.split(key, 3)
    w1, b1 = linear(k1, 4, 32)
    w2, b2 = linear(k2, 32, 16)
    w3, b3 = linear(k3, 16, 3)
    return {"w1": w1, "b1": b1, "w2": w2, "b2": b2, "w3": w3, "b3": b3}


def reference_forward(x, p):
    h1 = jnp.maximum(x @ p["w1"] + p["b1"], 0.0)
    h2 = jnp.maximum(h1 @ p["w2"] + p["b2"], 0.0)
    return h2 @ p["w3"] + p["b3"]


if __name__ == "__main__":
    key = jax.random.PRNGKey(0)
    kp, kx1, kx2 = jax.random.split(key, 3)
    params = init_params(kp)

    # Case 1: small batch, single grid step, exact tile fit.
    B1 = 8
    x1 = jax.random.normal(kx1, (B1, 4), jnp.float32)
    out1 = jax.block_until_ready(net_forward(x1, params))
    ref1 = reference_forward(x1, params)
    assert out1.shape == (B1, 3), out1.shape
    assert jnp.allclose(out1, ref1, atol=1e-5, rtol=1e-5), "mismatch (case 1)"

    # Case 2: batch not divisible by the tile -> grid > 1 + ragged tail block.
    B2 = 20
    x2 = jax.random.normal(kx2, (B2, 4), jnp.float32)
    out2 = jax.block_until_ready(net_forward(x2, params, batch_tile=8))
    ref2 = reference_forward(x2, params)
    assert out2.shape == (B2, 3), out2.shape
    assert jnp.allclose(out2, ref2, atol=1e-5, rtol=1e-5), "mismatch (case 2)"

    print("KERNEL_OK")
</pallas_src>

<mosaic_0001>
module attributes {stable_mosaic.version = 11 : i64} {
  func.func @mlp_kernel(%arg0: i32, %arg1: memref<8x4xf32, #tpu.memory_space<vmem>>, %arg2: memref<4x32xf32, #tpu.memory_space<vmem>>, %arg3: memref<1x32xf32, #tpu.memory_space<vmem>>, %arg4: memref<32x16xf32, #tpu.memory_space<vmem>>, %arg5: memref<1x16xf32, #tpu.memory_space<vmem>>, %arg6: memref<16x3xf32, #tpu.memory_space<vmem>>, %arg7: memref<1x3xf32, #tpu.memory_space<vmem>>, %arg8: memref<8x3xf32, #tpu.memory_space<vmem>>) attributes {dimension_semantics = [#tpu.dimension_semantics<parallel>], iteration_bounds = array<i64: 1>, scalar_prefetch = 0 : i64, scratch_operands = 0 : i64, tpu.core_type = #tpu.core_type<tc>, window_params = [{transform_indices = @transform_0, window_bounds = array<i64: 8, 4>}, {pipeline_mode = #tpu.pipeline_mode<synchronous>, transform_indices = @transform_1, window_bounds = array<i64: 4, 32>}, {pipeline_mode = #tpu.pipeline_mode<synchronous>, transform_indices = @transform_2, window_bounds = array<i64: 1, 32>}, {pipeline_mode = #tpu.pipeline_mode<synchronous>, transform_indices = @transform_3, window_bounds = array<i64: 32, 16>}, {pipeline_mode = #tpu.pipeline_mode<synchronous>, transform_indices = @transform_4, window_bounds = array<i64: 1, 16>}, {pipeline_mode = #tpu.pipeline_mode<synchronous>, transform_indices = @transform_5, window_bounds = array<i64: 16, 3>}, {pipeline_mode = #tpu.pipeline_mode<synchronous>, transform_indices = @transform_6, window_bounds = array<i64: 1, 3>}, {transform_indices = @transform_7, window_bounds = array<i64: 8, 3>}]} {
    %c0 = arith.constant 0 : index
    %c0_0 = arith.constant 0 : index
    %0 = vector.load %arg1[%c0, %c0_0] : memref<8x4xf32, #tpu.memory_space<vmem>>, vector<8x4xf32>
    %c0_1 = arith.constant 0 : index
    %c0_2 = arith.constant 0 : index
    %1 = vector.load %arg2[%c0_1, %c0_2] : memref<4x32xf32, #tpu.memory_space<vmem>>, vector<4x32xf32>
    %cst = arith.constant dense<0.000000e+00> : vector<8x32xf32>
    %2 = tpu.matmul %0, %1, %cst {dimension_numbers = #tpu.dot_dimension_numbers<[1], [0], [0], [1], [0, 0, 1, 1], [], []>, precision = #tpu.contract_precision<fp32>} : vector<8x4xf32>, vector<4x32xf32>, vector<8x32xf32> -> vector<8x32xf32>
    %c0_3 = arith.constant 0 : index
    %c0_4 = arith.constant 0 : index
    %3 = vector.load %arg3[%c0_3, %c0_4] : memref<1x32xf32, #tpu.memory_space<vmem>>, vector<1x32xf32>
    %4 = vector.broadcast %3 : vector<1x32xf32> to vector<8x32xf32>
    %5 = arith.addf %2, %4 : vector<8x32xf32>
    %cst_5 = arith.constant 0.000000e+00 : f32
    %6 = vector.broadcast %cst_5 : f32 to vector<8x32xf32>
    %7 = arith.maximumf %5, %6 : vector<8x32xf32>
    %c0_6 = arith.constant 0 : index
    %c0_7 = arith.constant 0 : index
    %8 = vector.load %arg4[%c0_6, %c0_7] : memref<32x16xf32, #tpu.memory_space<vmem>>, vector<32x16xf32>
    %cst_8 = arith.constant dense<0.000000e+00> : vector<8x16xf32>
    %9 = tpu.matmul %7, %8, %cst_8 {dimension_numbers = #tpu.dot_dimension_numbers<[1], [0], [0], [1], [0, 0, 1, 1], [], []>, precision = #tpu.contract_precision<fp32>} : vector<8x32xf32>, vector<32x16xf32>, vector<8x16xf32> -> vector<8x16xf32>
    %c0_9 = arith.constant 0 : index
    %c0_10 = arith.constant 0 : index
    %10 = vector.load %arg5[%c0_9, %c0_10] : memref<1x16xf32, #tpu.memory_space<vmem>>, vector<1x16xf32>
    %11 = vector.broadcast %10 : vector<1x16xf32> to vector<8x16xf32>
    %12 = arith.addf %9, %11 : vector<8x16xf32>
    %cst_11 = arith.constant 0.000000e+00 : f32
    %13 = vector.broadcast %cst_11 : f32 to vector<8x16xf32>
    %14 = arith.maximumf %12, %13 : vector<8x16xf32>
    %c0_12 = arith.constant 0 : index
    %c0_13 = arith.constant 0 : index
    %15 = vector.load %arg6[%c0_12, %c0_13] : memref<16x3xf32, #tpu.memory_space<vmem>>, vector<16x3xf32>
    %cst_14 = arith.constant dense<0.000000e+00> : vector<8x3xf32>
    %16 = tpu.matmul %14, %15, %cst_14 {dimension_numbers = #tpu.dot_dimension_numbers<[1], [0], [0], [1], [0, 0, 1, 1], [], []>, precision = #tpu.contract_precision<fp32>} : vector<8x16xf32>, vector<16x3xf32>, vector<8x3xf32> -> vector<8x3xf32>
    %c0_15 = arith.constant 0 : index
    %c0_16 = arith.constant 0 : index
    %17 = vector.load %arg7[%c0_15, %c0_16] : memref<1x3xf32, #tpu.memory_space<vmem>>, vector<1x3xf32>
    %18 = vector.broadcast %17 : vector<1x3xf32> to vector<8x3xf32>
    %19 = arith.addf %16, %18 : vector<8x3xf32>
    %c0_17 = arith.constant 0 : index
    %c0_18 = arith.constant 0 : index
    %20 = vector.load %arg8[%c0_17, %c0_18] : memref<8x3xf32, #tpu.memory_space<vmem>>, vector<8x3xf32>
    tpu.vector_store %arg8[%c0_17, %c0_18], %19 {strides = array<i32>} : memref<8x3xf32, #tpu.memory_space<vmem>>, vector<8x3xf32>,
    return
  }
  func.func @transform_0(%arg0: i32) -> (i32, i32) {
    %c0_i32 = arith.constant 0 : i32
    %c0_i32_0 = arith.constant 0 : i32
    return %arg0, %c0_i32 : i32, i32
  }
  func.func @transform_1(%arg0: i32) -> (i32, i32) {
    %c0_i32 = arith.constant 0 : i32
    %c0_i32_0 = arith.constant 0 : i32
    %c0_i32_1 = arith.constant 0 : i32
    return %c0_i32, %c0_i32_0 : i32, i32
  }
  func.func @transform_2(%arg0: i32) -> (i32, i32) {
    %c0_i32 = arith.constant 0 : i32
    %c0_i32_0 = arith.constant 0 : i32
    %c0_i32_1 = arith.constant 0 : i32
    return %c0_i32, %c0_i32_0 : i32, i32
  }
  func.func @transform_3(%arg0: i32) -> (i32, i32) {
    %c0_i32 = arith.constant 0 : i32
    %c0_i32_0 = arith.constant 0 : i32
    %c0_i32_1 = arith.constant 0 : i32
    return %c0_i32, %c0_i32_0 : i32, i32
  }
  func.func @transform_4(%arg0: i32) -> (i32, i32) {
    %c0_i32 = arith.constant 0 : i32
    %c0_i32_0 = arith.constant 0 : i32
    %c0_i32_1 = arith.constant 0 : i32
    return %c0_i32, %c0_i32_0 : i32, i32
  }
  func.func @transform_5(%arg0: i32) -> (i32, i32) {
    %c0_i32 = arith.constant 0 : i32
    %c0_i32_0 = arith.constant 0 : i32
    %c0_i32_1 = arith.constant 0 : i32
    return %c0_i32, %c0_i32_0 : i32, i32
  }
  func.func @transform_6(%arg0: i32) -> (i32, i32) {
    %c0_i32 = arith.constant 0 : i32
    %c0_i32_0 = arith.constant 0 : i32
    %c0_i32_1 = arith.constant 0 : i32
    return %c0_i32, %c0_i32_0 : i32, i32
  }
  func.func @transform_7(%arg0: i32) -> (i32, i32) {
    %c0_i32 = arith.constant 0 : i32
    %c0_i32_0 = arith.constant 0 : i32
    return %arg0, %c0_i32 : i32, i32
  }
}

</mosaic_0001>

<bundles_post_ra>
// kernel: tpu_custom_call.1
= control target key start
LH: loop header
LB: loop body
LE: loop exit
PB: predicated region body
PF: predicated region fallthrough
CT: control target
= control target key end

     0   :  { %vm39_vm0 = vcmask 1043456   ;;  %vm35_vm1 = vcmask 31744   ;;  %v1760_v0 = vmov 0.0   ;;  %vm1761_vm2 = vmmov 0   ;;  %s1904_s1 = inlined_call_operand.vmem [shape: f32[4,32], index: 1, kind: input, shape index: {}]   ;;  %s1905_s0 = inlined_call_operand.vmem [shape: f32[8,4], index: 0, kind: input, shape index: {}]   ;;  %s1906_s3 = inlined_call_operand.vmem [shape: f32[32,16], index: 3, kind: input, shape index: {}]   ;;  %s1907_s2 = inlined_call_operand.vmem [shape: f32[1,32], index: 2, kind: input, shape index: {}]   ;;  %s1908_s5 = inlined_call_operand.vmem [shape: f32[16,3], index: 5, kind: input, shape index: {}]   ;;  %s1909_s4 = inlined_call_operand.vmem [shape: f32[1,16], index: 4, kind: input, shape index: {}]   ;;  %s1910_s6 = inlined_call_operand.vmem [shape: f32[1,3], index: 6, kind: input, shape index: {}]   ;;  %s1911_s7 = inlined_call_operand.vmem [shape: f32[8,3], index: 7, kind: output, shape index: {}]  }
   0x1   :  { %1532 = vmatprep.subr.mxu0 %v1760_v0  ;;  %v27_v1 = vld [vmem:[%s1904_s1] sm:$0xf]  ;;  %1534 = vmatprep.mubr.msk.f32.mxu0 %vm1761_vm2, %v1760_v0  ;;  %v491_v16 = vld [vmem:[%s1906_s3 + $0x8] sm:$0xff]  ;;  %v1762_v22 = vmov 0.0|0.0   ;;  %v492_v23 = vld [vmem:[%s1906_s3 + $0x10] sm:$0xff]  ;;  %vm501_vm3 = vcmask 261120  }
   0x2   :  { %v26_v2 = vld [vmem:[%s1905_s0] sm:$0xff]  ;;  %v41_v3 = vsel %vm39_vm0, %v27_v1, 0  ;;  %1570 = vmatprep.mubr.msk.f32.mxu1 %vm1761_vm2, %v1760_v0  ;;  %v509_v18 = vand.u32 4294901760, %v491_v16  ;;  %1670 = vmatprep.subr.bf16.mxu1 %v1762_v22  ;;  %v493_v24 = vld [vmem:[%s1906_s3 + $0x18] sm:$0xff]  ;;  %v512_v25 = vand.u32 4294901760, %v492_v23  ;;  %v992_v60 = vld [vmem:[%s1908_s5 + $0x8] sm:$0xff] }
   0x3   :  { %v37_v4 = vsel %vm35_vm1, %v26_v2, 0  ;;  %v44_v5 = vand.u32 4294901760, %v41_v3  ;;  %v490_v15 = vld [vmem:[%s1906_s3] sm:$0xff]  ;;  %v515_v26 = vand.u32 4294901760, %v493_v24  ;;  %v1008_v62 = vand.u32 4294901760, %v992_v60 }
   0x4   :  { %v109_v6 = vand.u32 4294901760, %v37_v4  ;;  %v506_v17 = vand.u32 4294901760, %v490_v15  ;;  %v593_v21 = vsub.f32 %v491_v16, %v509_v18  ;;  %v600_v30 = vsub.f32 %v492_v23, %v512_v25  ;;  %v1469_v48 = vld [vmem:[%s1907_s2] ss:$0 sm:$0xff] }
   0x5   :  { %1533 = vmatpush3.msra.mxu0 %v44_v5  ;;  %v121_v7 = vsub.f32 %v41_v3, %v44_v5  ;;  %v1674_v29 = vpack.c.bf16 %v515_v26, %v512_v25  ;;  %v607_v31 = vsub.f32 %v493_v24, %v515_v26  ;;  %v991_v59 = vld [vmem:[%s1908_s5] sm:$0xff]  ;;  %v1090_v2 = vsub.f32 %v992_v60, %v1008_v62 }
   0x6   :  { %v110_v8 = vsub.f32 %v37_v4, %v109_v6  ;;  %1537 = vmatprep.subr.mxu0 %v1760_v0  ;;  %v1837_v19 = vpack.c.bf16 %v509_v18, %v506_v17  ;;  %v586_v20 = vsub.f32 %v490_v15, %v506_v17  ;;  %v594_v28 = vand.u32 4294901760, %v593_v21  ;;  %v1471_v24 = vld [vmem:[%s1910_s6] ss:$0 sm:$0xff] }
   0x7   :  { %v122_v10 = vand.u32 4294901760, %v121_v7  ;;  %v601_v35 = vand.u32 4294901760, %v600_v30  ;;  %v608_v36 = vand.u32 4294901760, %v607_v31  ;;  %v1686_v45 = vpack.c.bf16 %v607_v31, %v600_v30 }
   0x8   :  { %v111_v9 = vand.u32 4294901760, %v110_v8  ;;  %1672 = vmatpush3.bf16.msra.mxu1 %v1837_v19  ;;  %v587_v27 = vand.u32 4294901760, %v586_v20  ;;  %v595_v33 = vsub.f32 %v593_v21, %v594_v28  ;;  %v1683_v44 = vpack.c.bf16 %v593_v21, %v586_v20 }
   0x9   :  { %v123_v12 = vsub.f32 %v121_v7, %v122_v10  ;;  %1673 = vmatprep.subr.bf16.mxu1 %v1762_v22  ;;  %v602_v38 = vsub.f32 %v600_v30, %v601_v35  ;;  %v609_v39 = vsub.f32 %v607_v31, %v608_v36  ;;  %v1698_v47 = vpack.c.bf16 %v608_v36, %v601_v35 }
   0xa   :  { %v112_v11 = vsub.f32 %v110_v8, %v111_v9  ;;  %v588_v32 = vsub.f32 %v586_v20, %v587_v27  ;;  %v596_v37 = vand.u32 4294901760, %v595_v33  ;;  %v1695_v46 = vpack.c.bf16 %v594_v28, %v587_v27 }
   0xb   :  { %v124_v14 = vand.u32 4294901760, %v123_v12  ;;  %v603_v41 = vand.u32 4294901760, %v602_v38  ;;  %v610_v42 = vand.u32 4294901760, %v609_v39  ;;  %v1005_v61 = vand.u32 4294901760, %v991_v59  ;;  %v1470_v12 = vld [vmem:[%s1909_s4] ss:$0 sm:$0xff] }
   0xc   :  { %v113_v13 = vand.u32 4294901760, %v112_v11  ;;  %1675 = vmatpush3.bf16.msra.mxu1 %v1674_v29  ;;  %v589_v34 = vand.u32 4294901760, %v588_v32  ;;  %v1091_v4 = vand.u32 4294901760, %v1090_v2  ;;  %vm1000_vm4 = vcmask 130048  }
   0xd   :  { %1676 = vmatprep.subr.bf16.mxu1 %v1762_v22  ;;  %v1680_v43 = vpack.c.bf16 %v610_v42, %v603_v41  ;;  %v1707_v63 = vpack.c.bf16 %v1008_v62, %v1005_v61  ;;  %v1083_v1 = vsub.f32 %v991_v59, %v1005_v61  ;;  %vm1463_vm5 = vcmask 23552  }
   0xe   :  { %1535 = vmatmul.mubr.f32.vlgmr.msra.gmra.mrb[0].mxu0 %v113_v13  ;;  %v1677_v40 = vpack.c.bf16 %v596_v37, %v589_v34 }
   0xf   :  { %1538 = vmatpush3.msra.mxu0 %v124_v14  ;;  %1539 = vmatprep.mubr.msk.f32.mxu0 %vm1761_vm2, %v1760_v0  ;;  %v1084_v3 = vand.u32 4294901760, %v1083_v1 }
  0x10   :  { %1542 = vmatprep.subr.mxu0 %v1760_v0 }
  0x11   :  { %v1719_v11 = vpack.c.bf16 %v1091_v4, %v1084_v3 }
  0x16   :  { %1540 = vmatmul.mubr.f32.vlgmr.msra.gmra.mrb[0].mxu0 %v109_v6 }
  0x17   :  { %1543 = vmatpush3.msra.mxu0 %v121_v7  ;;  %1544 = vmatprep.mubr.msk.f32.mxu0 %vm1761_vm2, %v1760_v0 }
  0x18   :  { %1547 = vmatprep.subr.mxu0 %v1760_v0 }
  0x1e   :  { %1545 = vmatmul.mubr.f32.vlgmr.msra.gmra.mrb[0].mxu0 %v110_v8 }
  0x1f   :  { %1548 = vmatpush3.msra.mxu0 %v44_v5  ;;  %1549 = vmatprep.mubr.msk.f32.mxu0 %vm1761_vm2, %v1760_v0 }
  0x20   :  { %1552 = vmatprep.subr.mxu0 %v1760_v0 }
  0x26   :  { %1550 = vmatmul.mubr.f32.vlgmr.msra.gmra.mrb[0].mxu0 %v111_v9 }
  0x27   :  { %1553 = vmatpush3.msra.mxu0 %v122_v10  ;;  %1554 = vmatprep.mubr.msk.f32.mxu0 %vm1761_vm2, %v1760_v0  ;;  %v1713_v10 = vpack.c.bf16 %v1090_v2, %v1083_v1 }
  0x28   :  { %1557 = vmatprep.subr.mxu0 %v1760_v0 }
  0x2e   :  { %1555 = vmatmul.mubr.f32.vlgmr.msra.gmra.mrb[0].mxu0 %v109_v6 }
  0x2f   :  { %1558 = vmatpush3.msra.mxu0 %v44_v5  ;;  %1559 = vmatprep.mubr.msk.f32.mxu0 %vm1761_vm2, %v1760_v0  ;;  %v1085_v5 = vsub.f32 %v1083_v1, %v1084_v3 }
  0x30   :  { %1706 = vmatprep.subr.bf16.mxu0 %v1762_v22 }
  0x31   :  { %v1086_v7 = vand.u32 4294901760, %v1085_v5 }
  0x36   :  { %1560 = vmatmul.mubr.f32.vlgmr.msra.gmra.mrb[0].mxu0 %v109_v6  ;;  %v1092_v6 = vsub.f32 %v1090_v2, %v1091_v4 }
  0x37   :  { %1632 = vmatprep.mubr.msk.f32.mxu0 %vm1761_vm2, %v1760_v0  ;;  %1708 = vmatpush3.bf16.msra.mxu0 %v1707_v63 }
  0x38   :  { %1709 = vmatprep.subr.bf16.mxu0 %v1762_v22  ;;  %v1093_v8 = vand.u32 4294901760, %v1092_v6 }
  0x3a   :  { %v1710_v9 = vpack.c.bf16 %v1093_v8, %v1086_v7 }
 0x109   :  { %v485_v49 = vpop.f32.mrb[0].mxu0 }
 0x10a   :  { %v1724_v50 = vadd.f32 %v1469_v48, %v485_v49  ;;  %v1561_v51 = vpop.f32.mrb[1].mxu0 }
 0x10c   :  { %v489_v52 = vmax.f32 %v1724_v50, 0.0 }
 0x10e   :  { %v503_v53 = vsel %vm501_vm3, %v489_v52, 0 }
 0x10f   :  { %v574_v54 = vand.u32 4294901760, %v503_v53 }
 0x111   :  { %v575_v55 = vsub.f32 %v503_v53, %v574_v54 }
 0x113   :  { %v576_v56 = vand.u32 4294901760, %v575_v55 }
 0x115   :  { %v577_v57 = vsub.f32 %v575_v55, %v576_v56 }
 0x117   :  { %v578_v58 = vand.u32 4294901760, %v577_v57 }
 0x119   :  { %1571 = vmatmul.mubr.f32.vlgmr.msra.gmra.mrb[0].mxu1 %v578_v58 }
 0x11a   :  { %1678 = vmatpush3.bf16.msra.mxu1 %v1677_v40  ;;  %1581 = vmatprep.mubr.msk.f32.mxu1 %vm1761_vm2, %v1760_v0 }
 0x11b   :  { %1679 = vmatprep.subr.bf16.mxu1 %v1762_v22 }
 0x11e   :  { %1681 = vmatpush3.bf16.msra.mxu1 %v1680_v43 }
 0x11f   :  { %1682 = vmatprep.subr.bf16.mxu1 %v1762_v22 }
 0x121   :  { %1582 = vmatmul.mubr.f32.vlgmr.msra.gmra.mrb[0].mxu1 %v574_v54 }
 0x122   :  { %1684 = vmatpush3.bf16.msra.mxu1 %v1683_v44  ;;  %1592 = vmatprep.mubr.msk.f32.mxu1 %vm1761_vm2, %v1760_v0 }
 0x123   :  { %1685 = vmatprep.subr.bf16.mxu1 %v1762_v22 }
 0x126   :  { %1687 = vmatpush3.bf16.msra.mxu1 %v1686_v45 }
 0x127   :  { %1688 = vmatprep.subr.bf16.mxu1 %v1762_v22 }
 0x129   :  { %1593 = vmatmul.mubr.f32.vlgmr.msra.gmra.mrb[0].mxu1 %v575_v55 }
 0x12a   :  { %1690 = vmatpush3.bf16.msra.mxu1 %v1837_v19  ;;  %1603 = vmatprep.mubr.msk.f32.mxu1 %vm1761_vm2, %v1760_v0 }
 0x12b   :  { %1691 = vmatprep.subr.bf16.mxu1 %v1762_v22 }
 0x12e   :  { %1693 = vmatpush3.bf16.msra.mxu1 %v1674_v29 }
 0x12f   :  { %1694 = vmatprep.subr.bf16.mxu1 %v1762_v22 }
 0x131   :  { %1604 = vmatmul.mubr.f32.vlgmr.msra.gmra.mrb[0].mxu1 %v576_v56 }
 0x132   :  { %1696 = vmatpush3.bf16.msra.mxu1 %v1695_v46  ;;  %1614 = vmatprep.mubr.msk.f32.mxu1 %vm1761_vm2, %v1760_v0 }
 0x133   :  { %1697 = vmatprep.subr.bf16.mxu1 %v1762_v22 }
 0x136   :  { %1699 = vmatpush3.bf16.msra.mxu1 %v1698_v47 }
 0x137   :  { %1700 = vmatprep.subr.bf16.mxu1 %v1762_v22 }
 0x139   :  { %1615 = vmatmul.mubr.f32.vlgmr.msra.gmra.mrb[0].mxu1 %v574_v54 }
 0x13a   :  { %1702 = vmatpush3.bf16.msra.mxu1 %v1837_v19  ;;  %1625 = vmatprep.mubr.msk.f32.mxu1 %vm1761_vm2, %v1760_v0 }
 0x13b   :  { %1703 = vmatprep.subr.bf16.mxu1 %v1762_v22 }
 0x13e   :  { %1705 = vmatpush3.bf16.msra.mxu1 %v1674_v29 }
 0x141   :  { %1626 = vmatmul.mubr.f32.vlgmr.msra.gmra.mrb[0].mxu1 %v574_v54 }
 0x214   :  { %v986_v13 = vpop.f32.mrb[0].mxu1 }
 0x215   :  { %v1725_v14 = vadd.f32 %v1470_v12, %v986_v13  ;;  %v1627_v15 = vpop.f32.mrb[1].mxu1 }
 0x217   :  { %v990_v16 = vmax.f32 %v1725_v14, 0.0 }
 0x219   :  { %v1002_v17 = vsel %vm1000_vm4, %v990_v16, 0 }
 0x21a   :  { %v1071_v18 = vand.u32 4294901760, %v1002_v17 }
 0x21c   :  { %v1072_v19 = vsub.f32 %v1002_v17, %v1071_v18 }
 0x21e   :  { %v1073_v20 = vand.u32 4294901760, %v1072_v19 }
 0x220   :  { %v1074_v21 = vsub.f32 %v1072_v19, %v1073_v20 }
 0x222   :  { %v1075_v23 = vand.u32 4294901760, %v1074_v21 }
 0x224   :  { %1633 = vmatmul.mubr.f32.vlgmr.msra.gmra.mrb[2].mxu0 %v1075_v23 }
 0x225   :  { %1711 = vmatpush3.bf16.msra.mxu0 %v1710_v9  ;;  %1639 = vmatprep.mubr.msk.f32.mxu0 %vm1761_vm2, %v1760_v0 }
 0x226   :  { %1712 = vmatprep.subr.bf16.mxu0 %v1762_v22 }
 0x22c   :  { %1640 = vmatmul.mubr.f32.vlgmr.msra.gmra.mrb[2].mxu0 %v1071_v18 }
 0x22d   :  { %1714 = vmatpush3.bf16.msra.mxu0 %v1713_v10  ;;  %1646 = vmatprep.mubr.msk.f32.mxu0 %vm1761_vm2, %v1760_v0 }
 0x22e   :  { %1715 = vmatprep.subr.bf16.mxu0 %v1762_v22 }
 0x234   :  { %1647 = vmatmul.mubr.f32.vlgmr.msra.gmra.mrb[2].mxu0 %v1072_v19 }
 0x235   :  { %1717 = vmatpush3.bf16.msra.mxu0 %v1707_v63  ;;  %1653 = vmatprep.mubr.msk.f32.mxu0 %vm1761_vm2, %v1760_v0 }
 0x236   :  { %1718 = vmatprep.subr.bf16.mxu0 %v1762_v22 }
 0x23c   :  { %1654 = vmatmul.mubr.f32.vlgmr.msra.gmra.mrb[2].mxu0 %v1073_v20 }
 0x23d   :  { %1720 = vmatpush3.bf16.msra.mxu0 %v1719_v11  ;;  %1660 = vmatprep.mubr.msk.f32.mxu0 %vm1761_vm2, %v1760_v0 }
 0x23e   :  { %1721 = vmatprep.subr.bf16.mxu0 %v1762_v22 }
 0x244   :  { %1661 = vmatmul.mubr.f32.vlgmr.msra.gmra.mrb[2].mxu0 %v1071_v18 }
 0x245   :  { %1723 = vmatpush3.bf16.msra.mxu0 %v1707_v63  ;;  %1667 = vmatprep.mubr.msk.f32.mxu0 %vm1761_vm2, %v1760_v0 }
 0x24c   :  { %1668 = vmatmul.mubr.f32.vlgmr.msra.gmra.mrb[2].mxu0 %v1071_v18 }
 0x31f   :  { %v1459_v25 = vpop.f32.mrb[2].mxu0 }
 0x320   :  { %v1726_v26 = vadd.f32 %v1471_v24, %v1459_v25  ;;  %v1669_v27 = vpop.f32.mrb[3].mxu0 }
 0x322   :  { %1464 = vst.msk [vmem:[%s1911_s7] sm:$0xff] %vm1463_vm5, %v1726_v26 }

</bundles_post_ra>
